<compile_context>
chip_gen: v7x
topology: tpu7x:2x2x1
jax: 0.10.0
libtpu: 0.0.40
codegen_flags: <defaults>
</compile_context>

<pallas_src>
import jax
import jax.numpy as jnp
from jax import lax
from jax.experimental import pallas as pl
from jax.experimental.pallas import tpu as pltpu


def _round_up(x, m):
    return ((x + m - 1) // m) * m


def _vmem_capacity_bytes():
    """Physical VMEM per core; conservative 64 MiB (v7x) fallback."""
    try:
        cap = int(getattr(pltpu.get_tpu_info(), "vmem_capacity_bytes", 0))
        if cap > 0:
            return cap
    except Exception:
        pass
    return 64 << 20


def _detect_num_cores():
    """2 TensorCores per device only on v7x-class chips; v5e/v6e are single-TC."""
    # TODO(synk): switch to a structured core-count query if get_tpu_info exposes one.
    try:
        kind = jax.devices()[0].device_kind.lower()
    except Exception:
        return 1
    return 2 if ("v7" in kind or "7x" in kind) else 1


def _make_kernel(*, n_rows, tb, chunk, n_chunks, th, h_total, blocks_per_core,
                 core_axis, h_axis, blk_axis, needs_mask, needs_hmask):
    """Build the loss kernel for a fixed static configuration."""

    def _accum(x_ref, y_ref, acc_ref, start, count):
        # Upcast `count` (<= chunk) slices at a time: bounds f32 temporaries to
        # count * th * W regardless of the (possibly much larger) block depth tb.
        xc = x_ref[pl.ds(start, count)].astype(jnp.float32)   # (count, th, W)
        yc = y_ref[pl.ds(start, count)].astype(jnp.float32)
        d = xc - yc
        acc_ref[...] = acc_ref[...] + jnp.sum(d * d, axis=0)  # VPU adds only

    def kernel(x_ref, y_ref, area_ref, o_ref, acc_ref):
        i = pl.program_id(blk_axis)
        last_i = pl.num_programs(blk_axis) - 1

        @pl.when(i == 0)
        def _init():
            acc_ref[...] = jnp.zeros_like(acc_ref)

        if not needs_mask:
            # Exact fit: every row of every block is valid.
            def chunk_body(c, carry):
                _accum(x_ref, y_ref, acc_ref, c * chunk, chunk)
                return carry

            lax.fori_loop(0, n_chunks, chunk_body, 0, unroll=(n_chunks <= 8))
        else:
            # Ragged tail: only iterate over the valid rows of this block
            # (no wrapper-side padding, no per-element masking).
            p = pl.program_id(core_axis) if core_axis is not None else 0
            row0 = (p * blocks_per_core + i) * tb
            valid = jnp.clip(n_rows - row0, 0, tb)
            full = valid // chunk

            def chunk_body(c, carry):
                _accum(x_ref, y_ref, acc_ref, c * chunk, chunk)
                return carry

            lax.fori_loop(0, full, chunk_body, 0)

            if chunk > 1:
                def row_body(r, carry):
                    _accum(x_ref, y_ref, acc_ref, r, 1)
                    return carry

                lax.fori_loop(full * chunk, valid, row_body, 0)

        @pl.when(i == last_i)
        def _finalize():
            w = acc_ref[...] * area_ref[...].astype(jnp.float32)
            if needs_hmask:
                # Partial last H tile: zero rows beyond the real plane height
                # (use where/select so stale-VMEM NaNs cannot leak through).
                h0 = pl.program_id(h_axis) * th
                hid = h0 + lax.broadcasted_iota(jnp.int32, (th, 1), 0)
                w = jnp.where(hid < h_total, w, 0.0)
            o_ref[...] = jnp.sum(w).reshape(1, 1, 1, 1)

    return kernel


def cell_area_weighted_loss(invar, outvar, area, *, num_cores=None):
    """invar, outvar: [T, C, H, W]; area: [H, W] -> scalar float32 loss."""
    T, C, H, W = invar.shape
    assert outvar.shape == (T, C, H, W)
    assert area.shape == (H, W)
    n = T * C
    assert n >= 1

    x = invar.reshape(n, H, W)
    y = outvar.reshape(n, H, W)

    x_item = jnp.dtype(x.dtype).itemsize
    y_item = jnp.dtype(y.dtype).itemsize
    in_pair_item = x_item + y_item
    area_item = jnp.dtype(area.dtype).itemsize
    w_pad = _round_up(W, 128)                 # VMEM lane padding (sizing estimate only)

    if num_cores is None:
        num_cores = _detect_num_cores()

    vmem_cap = _vmem_capacity_bytes()
    vmem_limit = (vmem_cap // 4) * 3          # 96 MiB on 128-MiB chips, 48 MiB on v7x
    budget = int(vmem_limit * 0.7)            # headroom for Mosaic internal scratch

    def vmem_est(tb_, chunk_, th_):
        tile_ = th_ * w_pad
        return (2 * tb_ * tile_ * in_pair_item   # x & y blocks, double-buffered
                + 4 * chunk_ * tile_ * 4         # f32 temporaries in the chunk loop
                + tile_ * 4                      # (th, W) f32 accumulator
                + 2 * tile_ * area_item)         # VMEM-resident area tile

    # ---- th: rows of the (H, W) plane per block; tile H only when it must -------
    th = H
    if vmem_est(1, 1, H) > budget:
        per_row = vmem_est(1, 1, 1)
        th = (budget // per_row) // 8 * 8
        if th < 8 or vmem_est(1, 1, th) > budget:
            raise ValueError(
                "cell_area_weighted_loss: even an 8-row strip of the (H, W) plane "
                f"does not fit in VMEM (W={W}); the W axis would need tiling too.")
    h_tiles = pl.cdiv(H, th)

    # ---- chunk (slices upcast to f32 at a time) and tb (slices per block) -------
    tile = th * w_pad
    fixed = tile * 4 + 2 * tile * area_item
    chunk = max(1, min(8, (budget // 4) // (4 * tile * 4)))
    avail = budget - fixed - 4 * chunk * tile * 4
    if avail < 2 * tile * in_pair_item * chunk:
        chunk = 1
        avail = budget - fixed - 4 * tile * 4
    tb = max(chunk, avail // (2 * tile * in_pair_item))
    tb = int(min(tb, n))
    if tb >= chunk:
        tb = (tb // chunk) * chunk            # tb must be a multiple of chunk
    else:
        chunk = tb
    n_chunks = tb // chunk

    num_blocks = pl.cdiv(n, tb)
    blocks_per_core = pl.cdiv(num_blocks, num_cores)
    needs_mask = (num_cores * blocks_per_core * tb) != n
    needs_clamp = (num_cores * blocks_per_core) != num_blocks
    needs_hmask = (h_tiles * th) != H

    def blk_index(p, i):
        blk = p * blocks_per_core + i
        if needs_clamp:
            # Fully out-of-range blocks re-read the last real block; their rows are
            # all >= n so the in-kernel valid-row loop contributes exactly zero.
            blk = jnp.minimum(blk, num_blocks - 1)
        return blk

    if num_cores == 1:
        grid = (h_tiles, blocks_per_core)
        core_axis, h_axis, blk_axis = None, 0, 1
        semantics = ("arbitrary", "arbitrary")
        xy_map = lambda h, i: (blk_index(0, i), h, 0)
        area_map = lambda h, i: (h, 0)
        out_map = lambda h, i: (0, h, 0, 0)
    else:
        grid = (num_cores, h_tiles, blocks_per_core)
        core_axis, h_axis, blk_axis = 0, 1, 2
        semantics = ("parallel", "arbitrary", "arbitrary")
        xy_map = lambda p, h, i: (blk_index(p, i), h, 0)
        area_map = lambda p, h, i: (h, 0)
        out_map = lambda p, h, i: (p, h, 0, 0)

    kernel = _make_kernel(
        n_rows=n, tb=tb, chunk=chunk, n_chunks=n_chunks, th=th, h_total=H,
        blocks_per_core=blocks_per_core, core_axis=core_axis, h_axis=h_axis,
        blk_axis=blk_axis, needs_mask=needs_mask, needs_hmask=needs_hmask)

    bytes_accessed = (x.size * x_item + y.size * y_item
                      + H * W * area_item + num_cores * h_tiles * 4)

    partials = pl.pallas_call(
        kernel,
        out_shape=jax.ShapeDtypeStruct((num_cores, h_tiles, 1, 1), jnp.float32),
        grid_spec=pltpu.PrefetchScalarGridSpec(
            num_scalar_prefetch=0,
            grid=grid,
            in_specs=[
                pl.BlockSpec((tb, th, W), xy_map),
                pl.BlockSpec((tb, th, W), xy_map),
                # constant-per-h block index -> area is fetched once per h tile
                pl.BlockSpec((th, W), area_map),
            ],
            out_specs=pl.BlockSpec((1, 1, 1, 1), out_map),
            scratch_shapes=[pltpu.VMEM((th, W), jnp.float32)],
        ),
        compiler_params=pltpu.CompilerParams(
            dimension_semantics=semantics,
            vmem_limit_bytes=int(vmem_limit),
        ),
        cost_estimate=pl.CostEstimate(
            flops=3 * n * H * W + 2 * H * W,
            transcendentals=0,
            bytes_accessed=int(bytes_accessed),
        ),
    )(x, y, area)

    return jnp.sum(partials) / float(n * H * W)


if __name__ == "__main__":
    key = jax.random.PRNGKey(0)
    k1, k2, k3 = jax.random.split(key, 3)

    # Primary check: exact-fit path.
    T, C, H, W = 2, 4, 16, 16
    invar = jax.random.normal(k1, (T, C, H, W), dtype=jnp.float32)
    outvar = jax.random.normal(k2, (T, C, H, W), dtype=jnp.float32)
    area = jax.random.uniform(k3, (H, W), dtype=jnp.float32, minval=0.1, maxval=1.0)

    loss = cell_area_weighted_loss(invar, outvar, area)
    loss = jax.block_until_ready(loss)
    ref = jnp.mean(jnp.mean((invar - outvar) ** 2, axis=(0, 1)) * area)
    assert jnp.allclose(loss, ref, rtol=1e-5, atol=1e-6), (loss, ref)

    # Secondary check: ragged T*C (n=9 with tb=8) exercises the in-kernel
    # valid-row handling that replaced the wrapper-side jnp.pad.
    T2, C2 = 3, 3
    invar2 = jax.random.normal(k1, (T2, C2, H, W), dtype=jnp.float32)
    outvar2 = jax.random.normal(k2, (T2, C2, H, W), dtype=jnp.float32)
    loss2 = cell_area_weighted_loss(invar2, outvar2, area)
    loss2 = jax.block_until_ready(loss2)
    ref2 = jnp.mean(jnp.mean((invar2 - outvar2) ** 2, axis=(0, 1)) * area)
    assert jnp.allclose(loss2, ref2, rtol=1e-5, atol=1e-6), (loss2, ref2)

    print("KERNEL_OK")
</pallas_src>

<mosaic_0001>
module attributes {stable_mosaic.version = 11 : i64} {
  func.func @kernel(%arg0: i32, %arg1: i32, %arg2: memref<8x16x16xf32, #tpu.memory_space<vmem>>, %arg3: memref<8x16x16xf32, #tpu.memory_space<vmem>>, %arg4: memref<16x16xf32, #tpu.memory_space<vmem>>, %arg5: memref<1x1x1x1xf32, #tpu.memory_space<vmem>>, %arg6: memref<16x16xf32, #tpu.memory_space<vmem>>) attributes {dimension_semantics = [#tpu.dimension_semantics<arbitrary>, #tpu.dimension_semantics<arbitrary>], iteration_bounds = array<i64: 1, 1>, scalar_prefetch = 0 : i64, scratch_operands = 1 : i64, tpu.core_type = #tpu.core_type<tc>, window_params = [{transform_indices = @transform_0, window_bounds = array<i64: 8, 16, 16>}, {transform_indices = @transform_1, window_bounds = array<i64: 8, 16, 16>}, {transform_indices = @transform_2, window_bounds = array<i64: 16, 16>}, {transform_indices = @transform_3, window_bounds = array<i64: 1, 1, 1, 1>}]} {
    %c0_i32 = arith.constant 0 : i32
    %0 = arith.cmpi eq, %arg1, %c0_i32 : i32
    %1 = arith.extui %0 : i1 to i32
    %c0_i32_0 = arith.constant 0 : i32
    %2 = arith.cmpi ne, %1, %c0_i32_0 : i32
    scf.if %2 {
      %cst_11 = arith.constant 0.000000e+00 : f32
      %17 = vector.broadcast %cst_11 : f32 to vector<16x16xf32>
      %c0_12 = arith.constant 0 : index
      %c0_13 = arith.constant 0 : index
      %18 = vector.load %arg6[%c0_12, %c0_13] : memref<16x16xf32, #tpu.memory_space<vmem>>, vector<16x16xf32>
      tpu.vector_store %arg6[%c0_12, %c0_13], %17 {strides = array<i32>} : memref<16x16xf32, #tpu.memory_space<vmem>>, vector<16x16xf32>,
    } else {
    }
    %c0_i32_1 = arith.constant 0 : i32
    %c8_i32 = arith.constant 8 : i32
    %3 = arith.muli %c0_i32_1, %c8_i32 : i32
    %4 = arith.index_cast %3 : i32 to index
    %c0 = arith.constant 0 : index
    %c0_2 = arith.constant 0 : index
    %5 = vector.load %arg2[%4, %c0, %c0_2] : memref<8x16x16xf32, #tpu.memory_space<vmem>>, vector<8x16x16xf32>
    %6 = arith.index_cast %3 : i32 to index
    %c0_3 = arith.constant 0 : index
    %c0_4 = arith.constant 0 : index
    %7 = vector.load %arg3[%6, %c0_3, %c0_4] : memref<8x16x16xf32, #tpu.memory_space<vmem>>, vector<8x16x16xf32>
    %8 = arith.subf %5, %7 : vector<8x16x16xf32>
    %c0_5 = arith.constant 0 : index
    %c0_6 = arith.constant 0 : index
    %9 = vector.load %arg6[%c0_5, %c0_6] : memref<16x16xf32, #tpu.memory_space<vmem>>, vector<16x16xf32>
    %10 = arith.mulf %8, %8 : vector<8x16x16xf32>
    %cst = arith.constant dense<0.000000e+00> : vector<16x16xf32>
    %11 = vector.multi_reduction <add>, %10, %cst [0] : vector<8x16x16xf32> to vector<16x16xf32>
    %12 = arith.addf %9, %11 : vector<16x16xf32>
    %c0_7 = arith.constant 0 : index
    %c0_8 = arith.constant 0 : index
    %13 = vector.load %arg6[%c0_7, %c0_8] : memref<16x16xf32, #tpu.memory_space<vmem>>, vector<16x16xf32>
    tpu.vector_store %arg6[%c0_7, %c0_8], %12 {strides = array<i32>} : memref<16x16xf32, #tpu.memory_space<vmem>>, vector<16x16xf32>,
    %c1_i32 = arith.constant 1 : i32
    %c0_i32_9 = arith.constant 0 : i32
    %14 = arith.cmpi eq, %arg1, %c0_i32_9 : i32
    %15 = arith.extui %14 : i1 to i32
    %c0_i32_10 = arith.constant 0 : i32
    %16 = arith.cmpi ne, %15, %c0_i32_10 : i32
    scf.if %16 {
      %c0_11 = arith.constant 0 : index
      %c0_12 = arith.constant 0 : index
      %17 = vector.load %arg6[%c0_11, %c0_12] : memref<16x16xf32, #tpu.memory_space<vmem>>, vector<16x16xf32>
      %c0_13 = arith.constant 0 : index
      %c0_14 = arith.constant 0 : index
      %18 = vector.load %arg4[%c0_13, %c0_14] : memref<16x16xf32, #tpu.memory_space<vmem>>, vector<16x16xf32>
      %19 = arith.mulf %17, %18 : vector<16x16xf32>
      %20 = vector.shape_cast %19 : vector<16x16xf32> to vector<1x16x16xf32>
      %cst_15 = arith.constant dense<0.000000e+00> : vector<1xf32>
      %21 = vector.multi_reduction <add>, %20, %cst_15 [1, 2] : vector<1x16x16xf32> to vector<1xf32>
      %22 = vector.shape_cast %21 : vector<1xf32> to vector<1x1x1xf32>
      %23 = vector.extract %22[0, 0, 0] : f32 from vector<1x1x1xf32>
      %24 = vector.broadcast %23 : f32 to vector<1x1x1x1xf32>
      %c0_16 = arith.constant 0 : index
      %c0_17 = arith.constant 0 : index
      %c0_18 = arith.constant 0 : index
      %c0_19 = arith.constant 0 : index
      %25 = vector.load %arg5[%c0_16, %c0_17, %c0_18, %c0_19] : memref<1x1x1x1xf32, #tpu.memory_space<vmem>>, vector<1x1x1x1xf32>
      tpu.vector_store %arg5[%c0_16, %c0_17, %c0_18, %c0_19], %24 {strides = array<i32>} : memref<1x1x1x1xf32, #tpu.memory_space<vmem>>, vector<1x1x1x1xf32>,
    } else {
    }
    return
  }
  func.func @transform_0(%arg0: i32, %arg1: i32) -> (i32, i32, i32) {
    %c0_i32 = arith.constant 0 : i32
    %0 = arith.addi %c0_i32, %arg1 : i32
    %c0_i32_0 = arith.constant 0 : i32
    %c0_i32_1 = arith.constant 0 : i32
    return %0, %arg0, %c0_i32_0 : i32, i32, i32
  }
  func.func @transform_1(%arg0: i32, %arg1: i32) -> (i32, i32, i32) {
    %c0_i32 = arith.constant 0 : i32
    %0 = arith.addi %c0_i32, %arg1 : i32
    %c0_i32_0 = arith.constant 0 : i32
    %c0_i32_1 = arith.constant 0 : i32
    return %0, %arg0, %c0_i32_0 : i32, i32, i32
  }
  func.func @transform_2(%arg0: i32, %arg1: i32) -> (i32, i32) {
    %c0_i32 = arith.constant 0 : i32
    %c0_i32_0 = arith.constant 0 : i32
    return %arg0, %c0_i32 : i32, i32
  }
  func.func @transform_3(%arg0: i32, %arg1: i32) -> (i32, i32, i32, i32) {
    %c0_i32 = arith.constant 0 : i32
    %c0_i32_0 = arith.constant 0 : i32
    %c0_i32_1 = arith.constant 0 : i32
    %c0_i32_2 = arith.constant 0 : i32
    return %c0_i32, %arg0, %c0_i32_0, %c0_i32_1 : i32, i32, i32, i32
  }
}

</mosaic_0001>

<bundles_post_ra>
// kernel: tpu_custom_call.1
= control target key start
LH: loop header
LB: loop body
LE: loop exit
PB: predicated region body
PF: predicated region fallthrough
CT: control target
= control target key end

     0   :  { %8 = vsyncpa [#allocation4], 0  ;;  %s420_s0 = inlined_call_operand.hbm [shape: f32[8,16,16], index: 0, kind: input, shape index: {}]   ;;  %s421_s1 = inlined_call_operand.hbm [shape: f32[8,16,16], index: 1, kind: input, shape index: {}]   ;;  %s422_s2 = inlined_call_operand.hbm [shape: f32[16,16], index: 2, kind: input, shape index: {}]   ;;  %s423_s3 = inlined_call_operand.hbm [shape: f32[1,1,1,1], index: 3, kind: output, shape index: {}]  }
   0x1   :  { %9 = vsyncpa [#allocation7], 0 }
   0x2   :  { %10 = vsyncpa [#allocation5], 0  ;;  %s307_s12 = smov [#allocation6]   ;;  %s308_s14 = smov [#allocation3]  }
   0x3   :  { %s28_s13 = sshll.u32 %s307_s12, 4  ;;  %s16_s15 = sshll.u32 %s308_s14, 4  ;;  %s29_s13 = int_to_ptr.vmem [resolvable:$true] %s28_s13  ;;  %s334_s15 = int_to_ptr.vmem [resolvable:$true] %s16_s15 }
   0x4   :  { %s213_s18 = scalar_lea.hbm %s421_s1, 2048 }
   0x5   :  { %p214_p0 = scmp.ne.s32.totalorder %s421_s1, %s213_s18  ;;  %p217_p1 = scmp.lt.u32.totalorder %s213_s18, %s421_s1 }
   0x7   :  { %p219_p2 = pnand %p217_p1, %p214_p0 }
   0x9   :  { %222 = shalt.err (!%p219_p2)
}
   0xa   :  { %s223_s23 = scalar_lea.vmem %s29_s13, 2048  ;;  %p228_p4 = scmp.lt.s32.totalorder %s29_s13, %s29_s13 }
   0xb   :  { %p224_p3 = scmp.ne.s32.totalorder %s29_s13, %s223_s23  ;;  %p229_p5 = scmp.lt.s32.totalorder %s223_s23, %s223_s23 }
   0xd   :  { %p230_p6 = por %p229_p5, %p228_p4 }
   0xf   :  { %p231_p7 = pnand %p230_p6, %p224_p3 }
  0x11   :  { %234 = shalt.err (!%p231_p7)
}
  0x12   :  { %s309_s24 = smov 128   ;;  %s310_s25 = smov 8  }
  0x13   :  { %34 = dma.hbm_to_vmem [thread:$0]  %s421_s1, 2048, %s29_s13, [#allocation7], %s309_s24, %s309_s24, %s310_s25  }
  0x14   :  { %s235_s30 = scalar_lea.hbm %s420_s0, 2048 }
  0x15   :  { %p236_p8 = scmp.ne.s32.totalorder %s420_s0, %s235_s30  ;;  %p239_p9 = scmp.lt.u32.totalorder %s235_s30, %s420_s0 }
  0x17   :  { %p241_p10 = pnand %p239_p9, %p236_p8 }
  0x19   :  { %244 = shalt.err (!%p241_p10)
}
  0x1a   :  { %s245_s8 = scalar_lea.vmem %s334_s15, 2048  ;;  %p250_p12 = scmp.lt.s32.totalorder %s334_s15, %s334_s15 }
  0x1b   :  { %p246_p11 = scmp.ne.s32.totalorder %s334_s15, %s245_s8  ;;  %p251_p13 = scmp.lt.s32.totalorder %s245_s8, %s245_s8 }
  0x1d   :  { %p252_p0 = por %p251_p13, %p250_p12 }
  0x1f   :  { %p253_p1 = pnand %p252_p0, %p246_p11 }
  0x21   :  { %256 = shalt.err (!%p253_p1)
}
  0x22   :  { %22 = dma.hbm_to_vmem [thread:$0]  %s420_s0, 2048, %s334_s15, [#allocation4], %s309_s24, %s309_s24, %s310_s25  }
  0x23   :  { %s311_s10 = smov [#allocation8]   ;;  %s257_s14 = scalar_lea.hbm %s422_s2, 256 }
  0x24   :  { %s40_s11 = sshll.u32 %s311_s10, 4  ;;  %p258_p2 = scmp.ne.s32.totalorder %s422_s2, %s257_s14  ;;  %s41_s11 = int_to_ptr.vmem [resolvable:$true] %s40_s11 }
  0x25   :  { %p261_p3 = scmp.lt.u32.totalorder %s257_s14, %s422_s2 }
  0x27   :  { %p263_p4 = pnand %p261_p3, %p258_p2 }
  0x29   :  { %266 = shalt.err (!%p263_p4)
}
  0x2a   :  { %s267_s20 = scalar_lea.vmem %s41_s11, 256  ;;  %p272_p6 = scmp.lt.s32.totalorder %s41_s11, %s41_s11 }
  0x2b   :  { %p268_p5 = scmp.ne.s32.totalorder %s41_s11, %s267_s20  ;;  %p273_p7 = scmp.lt.s32.totalorder %s267_s20, %s267_s20 }
  0x2d   :  { %p274_p8 = por %p273_p7, %p272_p6 }
  0x2f   :  { %p275_p9 = pnand %p274_p8, %p268_p5 }
  0x31   :  { %278 = shalt.err (!%p275_p9)
}
  0x32   :  { %46 = dma.hbm_to_vmem [thread:$0]  %s422_s2, 256, %s41_s11, [#allocation7], %s309_s24, %s309_s24, %s310_s25  }
  0x33   :  { %301 = dma.done.wait [#allocation4], 2048  }
  0x34   :  { %302 = vsyncadd [#allocation4], 4294965248 }
  0x35   :  { %303 = dma.done.wait [#allocation7], 2304  }
  0x36   :  { %304 = vsyncadd [#allocation7], 4294964992  ;;  %vm60_vm0 = vcmask 130048   ;;  %v312_v0 = vmov 0.0   ;;  %v63_v1 = vld [vmem:[#allocation3] sm:$0xff]  ;;  %v65_v2 = vld [vmem:[#allocation3 + $0x10] sm:$0xff] }
  0x37   :  { %61 = vst.msk [vmem:[#allocation2] sm:$0xff] %vm60_vm0, %v312_v0  ;;  %62 = vst.msk [vmem:[#allocation2 + $0x8] sm:$0xff] %vm60_vm0, %v312_v0  ;;  %v64_v3 = vld [vmem:[#allocation3 + $0x8] sm:$0xff]  ;;  %v66_v4 = vld [vmem:[#allocation3 + $0x18] sm:$0xff]  ;;  %s313_s2 = smov [#allocation9]   ;;  %vm186_vm1 = vcmask 0  }
  0x38   :  { %v67_v5 = vld [vmem:[#allocation3 + $0x20] sm:$0xff]  ;;  %v68_v6 = vld [vmem:[#allocation3 + $0x28] sm:$0xff]  ;;  %v69_v7 = vld [vmem:[#allocation3 + $0x30] sm:$0xff]  ;;  %s194_s21 = sshll.u32 %s313_s2, 4  ;;  %s195_s21 = int_to_ptr.vmem [resolvable:$true] %s194_s21 }
  0x39   :  { %v79_v8 = vld [vmem:[#allocation6] sm:$0xff]  ;;  %v80_v9 = vld [vmem:[#allocation6 + $0x8] sm:$0xff]  ;;  %v70_v10 = vld [vmem:[#allocation3 + $0x38] sm:$0xff]  ;;  %s279_s23 = scalar_lea.vmem %s195_s21, 16  ;;  %s283_s24 = scalar_lea.vmem %s195_s21, 32 }
  0x3a   :  { %v81_v11 = vld [vmem:[#allocation6 + $0x10] sm:$0xff]  ;;  %v82_v12 = vld [vmem:[#allocation6 + $0x18] sm:$0xff]  ;;  %v83_v13 = vld [vmem:[#allocation6 + $0x20] sm:$0xff]  ;;  %v95_v14 = vsub.f32 %v63_v1, %v79_v8  ;;  %v96_v26 = vsub.f32 %v64_v3, %v80_v9  ;;  %p280_p10 = scmp.ne.s32.totalorder %s195_s21, %s279_s23  ;;  %p284_p11 = scmp.lt.s32.totalorder %s195_s21, %s195_s21 }
  0x3b   :  { %v71_v15 = vld [vmem:[#allocation3 + $0x40] sm:$0xff]  ;;  %v84_v16 = vld [vmem:[#allocation6 + $0x28] sm:$0xff]  ;;  %v85_v17 = vld [vmem:[#allocation6 + $0x30] sm:$0xff]  ;;  %v97_v18 = vsub.f32 %v65_v2, %v81_v11  ;;  %v99_v19 = vsub.f32 %v67_v5, %v83_v13  ;;  %v98_v27 = vsub.f32 %v66_v4, %v82_v12  ;;  %p285_p12 = scmp.lt.s32.totalorder %s283_s24, %s279_s23 }
  0x3c   :  { %v72_v20 = vld [vmem:[#allocation3 + $0x48] sm:$0xff]  ;;  %v86_v21 = vld [vmem:[#allocation6 + $0x38] sm:$0xff]  ;;  %v87_v22 = vld [vmem:[#allocation6 + $0x40] sm:$0xff]  ;;  %v100_v28 = vsub.f32 %v68_v6, %v84_v16  ;;  %v101_v29 = vsub.f32 %v69_v7, %v85_v17  ;;  %v113_v33 = vmul.f32 %v95_v14, %v95_v14  ;;  %v114_v45 = vmul.f32 %v96_v26, %v96_v26 }
  0x3d   :  { %v73_v23 = vld [vmem:[#allocation3 + $0x50] sm:$0xff]  ;;  %v88_v24 = vld [vmem:[#allocation6 + $0x48] sm:$0xff]  ;;  %v74_v30 = vld [vmem:[#allocation3 + $0x58] sm:$0xff]  ;;  %v102_v37 = vsub.f32 %v70_v10, %v86_v21  ;;  %v103_v38 = vsub.f32 %v71_v15, %v87_v22  ;;  %v115_v39 = vmul.f32 %v97_v18, %v97_v18  ;;  %v117_v40 = vmul.f32 %v99_v19, %v99_v19  ;;  %p286_p13 = por %p285_p12, %p284_p11 }
  0x3e   :  { %v89_v25 = vld [vmem:[#allocation6 + $0x50] sm:$0xff]  ;;  %v75_v31 = vld [vmem:[#allocation3 + $0x60] sm:$0xff]  ;;  %v76_v32 = vld [vmem:[#allocation3 + $0x68] sm:$0xff]  ;;  %v104_v41 = vsub.f32 %v72_v20, %v88_v24  ;;  %v116_v46 = vmul.f32 %v98_v27, %v98_v27  ;;  %v118_v47 = vmul.f32 %v100_v28, %v100_v28  ;;  %v119_v48 = vmul.f32 %v101_v29, %v101_v29 }
  0x3f   :  { %v90_v34 = vld [vmem:[#allocation6 + $0x58] sm:$0xff]  ;;  %v91_v35 = vld [vmem:[#allocation6 + $0x60] sm:$0xff]  ;;  %v92_v36 = vld [vmem:[#allocation6 + $0x68] sm:$0xff]  ;;  %v105_v42 = vsub.f32 %v73_v23, %v89_v25  ;;  %v130_v52 = vsel %vm60_vm0, %v113_v33, 0.0  ;;  %v120_v55 = vmul.f32 %v102_v37, %v102_v37  ;;  %v121_v56 = vmul.f32 %v103_v38, %v103_v38  ;;  %p287_p0 = pnand %p286_p13, %p280_p10 }
  0x40   :  { %v77_v43 = vld [vmem:[#allocation3 + $0x70] sm:$0xff]  ;;  %v106_v49 = vsub.f32 %v74_v30, %v90_v34  ;;  %v107_v50 = vsub.f32 %v75_v31, %v91_v35  ;;  %v108_v51 = vsub.f32 %v76_v32, %v92_v36  ;;  %v78_v53 = vld [vmem:[#allocation3 + $0x78] sm:$0xff]  ;;  %v131_v57 = vsel %vm60_vm0, %v115_v39, 0.0  ;;  %v169_v35 = vld [vmem:[#allocation8] sm:$0xff] }
  0x41   :  { %v93_v44 = vld [vmem:[#allocation6 + $0x70] sm:$0xff]  ;;  %v94_v54 = vld [vmem:[#allocation6 + $0x78] sm:$0xff]  ;;  %v133_v58 = vsel %vm60_vm0, %v117_v40, 0.0  ;;  %v122_v60 = vmul.f32 %v104_v41, %v104_v41  ;;  %v123_v61 = vmul.f32 %v105_v42, %v105_v42  ;;  %v132_v62 = vadd.f32 %v131_v57, %v130_v52  ;;  %v170_v37 = vld [vmem:[#allocation8 + $0x8] sm:$0xff] }
  0x42   :  { %v109_v59 = vsub.f32 %v77_v43, %v93_v44  ;;  %v135_v63 = vsel %vm60_vm0, %v119_v48, 0.0  ;;  %v145_v0 = vsel %vm60_vm0, %v114_v45, 0.0  ;;  %v146_v1 = vsel %vm60_vm0, %v116_v46, 0.0  ;;  %v111_v27 = vld [vmem:[#allocation2] sm:$0xff]  ;;  %v112_v31 = vld [vmem:[#allocation2 + $0x8] sm:$0xff] }
  0x43   :  { %v148_v2 = vsel %vm60_vm0, %v118_v47, 0.0  ;;  %v110_v3 = vsub.f32 %v78_v53, %v94_v54  ;;  %v134_v4 = vadd.f32 %v133_v58, %v132_v62  ;;  %v147_v5 = vadd.f32 %v146_v1, %v145_v0 }
  0x44   :  { %v124_v6 = vmul.f32 %v106_v49, %v106_v49  ;;  %v125_v7 = vmul.f32 %v107_v50, %v107_v50  ;;  %v137_v8 = vsel %vm60_vm0, %v121_v56, 0.0  ;;  %v150_v9 = vsel %vm60_vm0, %v120_v55, 0.0 }
  0x45   :  { %v136_v10 = vadd.f32 %v135_v63, %v134_v4  ;;  %v149_v11 = vadd.f32 %v148_v2, %v147_v5  ;;  %v126_v12 = vmul.f32 %v108_v51, %v108_v51  ;;  %v127_v13 = vmul.f32 %v109_v59, %v109_v59 }
  0x46   :  { %v139_v14 = vsel %vm60_vm0, %v123_v61, 0.0  ;;  %v152_v15 = vsel %vm60_vm0, %v122_v60, 0.0  ;;  %v128_v18 = vmul.f32 %v110_v3, %v110_v3  ;;  %v141_v19 = vsel %vm60_vm0, %v125_v7, 0.0 }
  0x47   :  { %v138_v16 = vadd.f32 %v137_v8, %v136_v10  ;;  %v151_v17 = vadd.f32 %v150_v9, %v149_v11  ;;  %v154_v20 = vsel %vm60_vm0, %v124_v6, 0.0  ;;  %v143_v23 = vsel %vm60_vm0, %v127_v13, 0.0 }
  0x48   :  { %v156_v24 = vsel %vm60_vm0, %v126_v12, 0.0  ;;  %v158_v28 = vsel %vm60_vm0, %v128_v18, 0.0 }
  0x49   :  { %v140_v21 = vadd.f32 %v139_v14, %v138_v16  ;;  %v153_v22 = vadd.f32 %v152_v15, %v151_v17 }
  0x4b   :  { %v142_v25 = vadd.f32 %v141_v19, %v140_v21  ;;  %v155_v26 = vadd.f32 %v154_v20, %v153_v22 }
  0x4d   :  { %v144_v29 = vadd.f32 %v143_v23, %v142_v25  ;;  %v157_v30 = vadd.f32 %v156_v24, %v155_v26 }
  0x4f   :  { %v159_v32 = vadd.f32 %v158_v28, %v157_v30  ;;  %v160_v33 = vadd.f32 %v144_v29, %v111_v27 }
  0x51   :  { %v161_v34 = vadd.f32 %v159_v32, %v112_v31  ;;  %162 = vst.msk [vmem:[#allocation2] sm:$0xff] %vm60_vm0, %v160_v33 }
  0x53   :  { %163 = vst.msk [vmem:[#allocation2 + $0x8] sm:$0xff] %vm60_vm0, %v161_v34 }
  0x58   :  { %v167_v36 = vld [vmem:[#allocation2] sm:$0xff] }
  0x59   :  { %v171_v38 = vmul.f32 %v169_v35, %v167_v36 }
  0x5a   :  { %v168_v39 = vld [vmem:[#allocation2 + $0x8] sm:$0xff] }
  0x5b   :  { %v172_v40 = vmul.f32 %v170_v37, %v168_v39  ;;  %v173_v41 = vsel %vm60_vm0, %v171_v38, 0.0 }
  0x5d   :  { %v174_v42 = vsel %vm60_vm0, %v172_v40, 0.0 }
  0x5e   :  { %v175_v43 = vadd.f32 %v174_v42, %v173_v41 }
  0x60   :  { %176 = vadd.xlane.f32.xlu0 %v175_v43 }
  0xed   :  { %v177_v44 = vpop.xlane.xlu0 %176 }
  0xee   :  { %v178_v45 = vrot.slane %v177_v44, 4 }
  0xf0   :  { %v179_v46 = vadd.f32 %v178_v45, %v177_v44 }
  0xf2   :  { %v180_v47 = vrot.slane %v179_v46, 2 }
  0xf4   :  { %v181_v48 = vadd.f32 %v180_v47, %v179_v46 }
  0xf6   :  { %v182_v49 = vrot.slane %v181_v48, 1 }
  0xf8   :  { %v183_v50 = vadd.f32 %v182_v49, %v181_v48 }
  0xfa   :  { %204 = vpush %v183_v50 }
 0x12b   :  { %s205_s22 = spop %204 }
 0x12c   :  { %v185_v51 = vstv %s205_s22 }
 0x12d   :  { %187 = vst.msk [vmem:[#allocation9] sm:$0x1] %vm186_vm1, %v185_v51 }
 0x12e   :  { %290 = shalt.err (!%p287_p0)
}
 0x12f   :  { %s291_s27 = scalar_lea.hbm %s423_s3, 16 }
 0x130   :  { %p292_p1 = scmp.ne.s32.totalorder %s423_s3, %s291_s27  ;;  %p295_p2 = scmp.lt.u32.totalorder %s291_s27, %s423_s3 }
 0x132   :  { %p297_p3 = pnand %p295_p2, %p292_p1 }
 0x134   :  { %300 = shalt.err (!%p297_p3)
}
 0x135   :  { %197 = dma.vmem_to_hbm [thread:$0]  %s195_s21, 16, %s423_s3, [#allocation5]  }
 0x136   :  { %305 = dma.done.wait [#allocation5], 16  }
 0x137   :  { %306 = vsyncadd [#allocation5], 4294967280 }
 0x138   :  { %201 = vsyncpa [#allocation4], 1 }
 0x139   :  { %202 = vsyncpa [#allocation7], 1 }
 0x13a   :  { %203 = vsyncpa [#allocation5], 1 }

</bundles_post_ra>
